<compile_context>
chip_gen: v6e
topology: v6e:2x2x1
jax: 0.10.0
libtpu: 0.0.40
codegen_flags: <defaults>
</compile_context>

<pallas_src>
import jax
import jax.numpy as jnp
from jax.experimental import pallas as pl
from jax.experimental.pallas import tpu as pltpu

_LANES = 128


def _row_granule(dtype):
    """Row-tiling granule that preserves native sublane packing.

    f32 -> 8 rows, bf16/f16 -> 16 rows, int8/fp8 -> 32 rows.
    """
    itemsize = jnp.dtype(dtype).itemsize
    return 8 * max(1, 4 // max(1, itemsize))


def _make_gompertz_kernel(a_eff, b, c):
    a_eff = float(a_eff)
    b = float(b)
    c = float(c)

    def kernel(x_ref, o_ref):
        # Load in native dtype, do the math in f32.
        # TODO(synk): if a v7x bundle dump shows the single EUP slot saturated
        # (2 f32 exps/element vs 3.2 TB/s HBM), switch the inner exp to bf16
        # there (bf16-capable EUP on v6e/v7x) after validating exp(exp)
        # precision; keep f32 on v5e (no bf16 EUP, HBM-bound anyway).
        x = x_ref[...].astype(jnp.float32)
        out = a_eff * jnp.exp(-b * jnp.exp(-c * x))
        o_ref[...] = out.astype(o_ref.dtype)

    return kernel


def gompertz(x, a=1.0, b=0.5, c=0.5, *, tile_rows=4096):
    """Elementwise Gompertz activation matching the PyTorch module.

    NOTE: the reference module's __init__ assigns self.a = b (not a); we keep
    that behaviour so forward() semantics match exactly.
    """
    del a  # unused by the reference module's forward (self.a = b)
    a_eff = float(b)
    b_f = float(b)
    c_f = float(c)

    orig_shape = x.shape
    orig_dtype = x.dtype
    total = x.size
    if total == 0:
        return x

    x_flat = jnp.ravel(x)

    # Split into a 128-aligned bulk (Pallas kernel) and a <=127-element tail
    # (plain jnp) — avoids the two extra full-HBM passes of pad + slice.
    bulk = (total // _LANES) * _LANES
    tail = total - bulk

    tail_out = None
    if tail:
        xt = x_flat[bulk:].astype(jnp.float32)
        tail_out = (a_eff * jnp.exp(-b_f * jnp.exp(-c_f * xt))).astype(orig_dtype)

    if bulk == 0:
        # Whole input is smaller than one lane row; nothing to tile.
        return tail_out.reshape(orig_shape)

    rows = bulk // _LANES
    x2d = x_flat[:bulk].reshape(rows, _LANES)

    granule = _row_granule(orig_dtype)

    if rows <= granule:
        # Single full-array block (full-extent block is always legal).
        tr = rows
    else:
        tr = min(int(tile_rows), rows)
        # Keep >= 2 grid steps so dimension_semantics=("parallel",) can shard
        # the grid across both v7x TensorCores (no cost on single-TC v5e/v6e).
        half = max(granule, (pl.cdiv(rows, 2) // granule) * granule)
        tr = min(tr, half)
        # Round to the dtype packing granule (f32:8, bf16:16, int8/fp8:32) so
        # stores stay unmasked and DMA tiling stays clean.
        tr = max(granule, (tr // granule) * granule)

    grid = (pl.cdiv(rows, tr),)

    itemsize = jnp.dtype(orig_dtype).itemsize
    block_bytes = tr * _LANES * itemsize
    # 2 double-buffered copies of (input block + output block) + headroom.
    needed = 4 * block_bytes + (4 << 20)
    vmem_limit = int(min(max(needed, 32 << 20), 48 << 20))

    cost = pl.CostEstimate(
        flops=3 * bulk,                       # negates/muls per element
        transcendentals=2 * bulk,             # two exps per element
        bytes_accessed=2 * bulk * itemsize,   # read + write, native dtype
    )

    out2d = pl.pallas_call(
        _make_gompertz_kernel(a_eff, b_f, c_f),
        out_shape=jax.ShapeDtypeStruct((rows, _LANES), orig_dtype),
        grid_spec=pltpu.PrefetchScalarGridSpec(
            num_scalar_prefetch=0,
            grid=grid,
            in_specs=[pl.BlockSpec((tr, _LANES), lambda i: (i, 0))],
            out_specs=pl.BlockSpec((tr, _LANES), lambda i: (i, 0)),
        ),
        compiler_params=pltpu.CompilerParams(
            dimension_semantics=("parallel",),
            vmem_limit_bytes=vmem_limit,
        ),
        cost_estimate=cost,
    )(x2d)

    out_flat = out2d.reshape(-1)
    if tail:
        out_flat = jnp.concatenate([out_flat, tail_out])
    return out_flat.reshape(orig_shape)


def _ref_gompertz(x, a=1.0, b=0.5, c=0.5):
    # Reference with the same self.a = b quirk as the PyTorch module.
    a_eff = b
    xf = x.astype(jnp.float32)
    return (a_eff * jnp.exp(-b * jnp.exp(-c * xf))).astype(x.dtype)


if __name__ == "__main__":
    key = jax.random.PRNGKey(0)

    # 1) Typical NCHW activation input (128-aligned: 2*4*16*16 = 2048 elems,
    #    rows=16 -> 2 grid steps, exercising the parallel grid path).
    x = jax.random.normal(key, (2, 4, 16, 16), dtype=jnp.float32)
    out = jax.block_until_ready(gompertz(x, a=1.0, b=0.5, c=0.5))
    ref = _ref_gompertz(x)
    assert out.shape == x.shape and out.dtype == x.dtype
    assert jnp.allclose(out, ref, atol=1e-6, rtol=1e-6)

    # 2) Non-128-multiple size: kernel on the aligned bulk, jnp on the tail.
    k2, k3 = jax.random.split(key)
    x2 = jax.random.normal(k2, (1, 130), dtype=jnp.float32)
    out2 = jax.block_until_ready(gompertz(x2, a=1.0, b=0.5, c=0.5))
    ref2 = _ref_gompertz(x2)
    assert out2.shape == x2.shape
    assert jnp.allclose(out2, ref2, atol=1e-6, rtol=1e-6)

    # 3) bf16 I/O path (16-row packing granule, f32 math in-register).
    x3 = jax.random.normal(k3, (2, 4, 16, 16), dtype=jnp.bfloat16)
    out3 = jax.block_until_ready(gompertz(x3, a=1.0, b=0.5, c=0.5))
    ref3 = _ref_gompertz(x3)
    assert out3.shape == x3.shape and out3.dtype == x3.dtype
    assert jnp.allclose(out3.astype(jnp.float32), ref3.astype(jnp.float32),
                        atol=1e-2, rtol=1e-2)

    print("KERNEL_OK")
</pallas_src>

<mosaic_0001>
module attributes {stable_mosaic.version = 11 : i64} {
  func.func @kernel(%arg0: i32, %arg1: memref<8x128xf32, #tpu.memory_space<vmem>>, %arg2: memref<8x128xf32, #tpu.memory_space<vmem>>) attributes {dimension_semantics = [#tpu.dimension_semantics<parallel>], iteration_bounds = array<i64: 2>, scalar_prefetch = 0 : i64, scratch_operands = 0 : i64, tpu.core_type = #tpu.core_type<tc>, window_params = [{transform_indices = @transform_0, window_bounds = array<i64: 8, 128>}, {transform_indices = @transform_1, window_bounds = array<i64: 8, 128>}]} {
    %c0 = arith.constant 0 : index
    %c0_0 = arith.constant 0 : index
    %0 = vector.load %arg1[%c0, %c0_0] : memref<8x128xf32, #tpu.memory_space<vmem>>, vector<8x128xf32>
    %cst = arith.constant -5.000000e-01 : f32
    %1 = vector.broadcast %cst : f32 to vector<8x128xf32>
    %2 = arith.mulf %1, %0 : vector<8x128xf32>
    %3 = math.exp %2 : vector<8x128xf32>
    %cst_1 = arith.constant -5.000000e-01 : f32
    %4 = vector.broadcast %cst_1 : f32 to vector<8x128xf32>
    %5 = arith.mulf %4, %3 : vector<8x128xf32>
    %6 = math.exp %5 : vector<8x128xf32>
    %cst_2 = arith.constant 5.000000e-01 : f32
    %7 = vector.broadcast %cst_2 : f32 to vector<8x128xf32>
    %8 = arith.mulf %7, %6 : vector<8x128xf32>
    %c0_3 = arith.constant 0 : index
    %c0_4 = arith.constant 0 : index
    %9 = vector.load %arg2[%c0_3, %c0_4] : memref<8x128xf32, #tpu.memory_space<vmem>>, vector<8x128xf32>
    tpu.vector_store %arg2[%c0_3, %c0_4], %8 {strides = array<i32>} : memref<8x128xf32, #tpu.memory_space<vmem>>, vector<8x128xf32>,
    return
  }
  func.func @transform_0(%arg0: i32) -> (i32, i32) {
    %c0_i32 = arith.constant 0 : i32
    %c0_i32_0 = arith.constant 0 : i32
    return %arg0, %c0_i32 : i32, i32
  }
  func.func @transform_1(%arg0: i32) -> (i32, i32) {
    %c0_i32 = arith.constant 0 : i32
    %c0_i32_0 = arith.constant 0 : i32
    return %arg0, %c0_i32 : i32, i32
  }
}

</mosaic_0001>

<bundles_post_ra>
// kernel: tpu_custom_call.1
= control target key start
LH: loop header
LB: loop body
LE: loop exit
PB: predicated region body
PF: predicated region fallthrough
CT: control target
= control target key end

     0   :  { %6 = vsyncpa [#allocation3], 0  ;;  %s534_s0 = inlined_call_operand.hbm [shape: f32[16,128], index: 0, kind: input, shape index: {}]   ;;  %s535_s1 = inlined_call_operand.hbm [shape: f32[16,128], index: 1, kind: output, shape index: {}]  }
   0x1   :  { %8 = vsyncpa [#allocation3 + $0x1], 0 }
   0x2   :  { %9 = vsyncpa [#allocation4], 0 }
   0x3   :  { %11 = vsyncpa [#allocation4 + $0x1], 0  ;;  %s393_s6 = smov 0   ;;  %s395_s7 = smov 0  }
   0x4   :  { %s397_s8 = smov 0   ;;  %s399_s9 = smov 0  }
   0x5 LB: > { %s414_s10 = sadd.s32 4294967295, %s379_s9   ;;  %s225_s11 = sadd.s32 4294967294, %s379_s9   ;;  %s379_s9 = sphi %s399_s9, %s552_s9   ;;  %s375_s8 = sphi %s397_s8, %s551_s8   ;;  %s371_s7 = sphi %s395_s7, %s550_s7   ;;  %s367_s6 = sphi %s393_s6, %s549_s6  }
   0x6   : > { %s418_s12 = sadd.s32 1, %s379_s9   ;;  %s24_s13 = sadd.s32 1, %s375_s8 }
   0x7   : > { %s21_s14 = ssub.s32 %s379_s9, %s418_s12  ;;  %p31_p0 = scmp.ne.s32.totalorder %s375_s8, %s371_s7 }
   0x8   : > { %p22_p1 = scmp.eq.s32.totalorder %s21_s14, 0  ;;  %p32_p2 = scmp.eq.s32.totalorder %s379_s9, 0 }
   0x9   : > { %p37_p3 = scmp.ne.s32.totalorder %s371_s7, %s367_s6  ;;  %p38_p4 = scmp.eq.s32.totalorder %s414_s10, 0 }
   0xa   : > { %s430_s15 = scalar_select %p22_p1, %s375_s8, %s24_s13  }
   0xb   : > { %p432_p5 = por %p32_p2, %p31_p0  ;;  %p436_p6 = por %p38_p4, %p37_p3 }
   0xc   : > { %p61_p7 = scmp.eq.s32.totalorder %s414_s10, 1  ;;  %p67_p8 = scmp.eq.s32.totalorder %s225_s11, 1 }
   0xd   : > { %s539_s17 = scalar_select %p436_p6, 1, 0 }
   0xe   : > { %p249_p10 = scmp.lt.s32.totalorder %s379_s9, 2  ;;  %p443_p11 = por %p61_p7, %p31_p0 }
   0xf   : > { %p447_p12 = por %p67_p8, %p37_p3  ;;  %s87_s20 = sand.u32 1, %s375_s8  }
  0x10   : > { %s540_s18 = scalar_select %p443_p11, 1, 0 }
  0x11   : > { %s541_s19 = scalar_select %p447_p12, 1, 0 }
  0x12   : > { %s229_s21 = sshll.u32 %s379_s9, 7  ;;  %s228_s22 = sshll.u32 %s87_s20, 3 }
  0x13   : > { %s456_s25 = scalar_lea.hbm %s534_s0, %s229_s21  ;;  %s91_s26 = scalar_lea.vmem [#allocation2], %s228_s22 }
  0x14   : > { %s98_s27 = sshll.u32 %s91_s26, 4  ;;  %p460_p13 = pnand %p249_p10, %p432_p5  ;;  %s464_s27 = int_to_ptr.vmem [resolvable:$true] %s98_s27 }
  0x15   : > { %s88_s29 = scalar_lea.sflag [#allocation3], %s87_s20  ;;  %s287_s30 = scalar_lea.hbm %s456_s25, 128 }
  0x16   : > { %p288_p2 = scmp.ne.s32.totalorder %s456_s25, %s287_s30  ;;  %p289_p3 = pneg %p460_p13 }
  0x17   : > { %s292_s4 = scalar_lea.hbm %s534_s0, 256  ;;  %p293_p5 = scmp.lt.s32.totalorder %s456_s25, %s534_s0 }
  0x18   : > { %p290_p4 = pnand %p289_p3, %p288_p2  ;;  %p294_p8 = scmp.lt.s32.totalorder %s292_s4, %s287_s30 }
  0x1a   : > { %p291_p7 = pneg %p290_p4  ;;  %p295_p10 = por %p294_p8, %p293_p5 }
  0x1c   : > { %p296_p9 = pnand %p295_p10, %p291_p7 }
  0x1e   : > { %299 = shalt.err (!%p296_p9)
}
  0x1f   : > { %s300_s13 = scalar_lea.vmem %s464_s27, 128  ;;  %s381_s14 = smov [#allocation2]  }
  0x20   : > { %p301_p0 = scmp.ne.s32.totalorder %s464_s27, %s300_s13  ;;  %s305_s16 = sshll.u32 %s381_s14, 4  ;;  %s306_s16 = int_to_ptr.vmem [resolvable:$false] %s305_s16 }
  0x21   : > { %s307_s20 = scalar_lea.vmem %s306_s16, 256  ;;  %p308_p4 = scmp.lt.s32.totalorder %s464_s27, %s306_s16 }
  0x22   : > { %p303_p1 = pnand %p301_p0, %p289_p3  ;;  %p309_p12 = scmp.lt.s32.totalorder %s307_s20, %s300_s13 }
  0x24   : > { %p304_p2 = pneg %p303_p1  ;;  %p310_p11 = por %p309_p12, %p308_p4 }
  0x26   : > { %p311_p6 = pnand %p310_p11, %p304_p2 }
  0x28   : > { %314 = shalt.err (!%p311_p6)
}
  0x29   : > { %244 = dma.hbm_to_vmem [thread:$0]  (!%p460_p13), %s456_s25, 128, %s464_s27, %s88_s29  }
  0x2a   : > { %p543_p9 = scmp.lt.s32.totalorder %s379_s9, 3  ;;  %p544_p7 = scmp.ge.s32.totalorder %s379_s9, 1 }
  0x2c   : > { %p104_p0 = pnand %p544_p7, %p543_p9 }
  0x2d   : > { %s491_s21 = sand.u32 (!%p104_p0), 1, %s371_s7   ;;  %p545_p6 = scmp.ne.s32.totalorder (!%p104_p0), %s539_s17, 0 }
  0x2e   : > { %107 = sbr.rel (%p104_p0) target bundleno = 104 (0x68), region = 24  ;;  %s231_s22 = sshll.u32 (!%p104_p0), %s491_s21, 3 }
  0x2f   : > { %s110_s23 = scalar_lea.sflag (!%p104_p0), [#allocation3], %s491_s21  ;;  %s113_s24 = scalar_lea.vmem (!%p104_p0), [#allocation2], %s231_s22 }
  0x33   : > { %358 = dma.done.wait (%p545_p6), %s110_s23, 128  }
  0x34   : > { %360 = vsyncadd (%p545_p6), %s110_s23, 4294967168  ;;  %v132_v0 = vld [vmem:[%s113_s24] sm:$0xff]  ;;  %s131_s25 = scalar_lea.vmem [#allocation5], %s231_s22  ;;  %s234_s27 = sshll.u32 %s414_s10, 7 }
  0x35   : > { %v133_v1 = vmul.f32 -0.5, %v132_v0  ;;  %s155_s26 = sshll.u32 %s131_s25, 4  ;;  %s153_s29 = scalar_lea.hbm %s535_s1, %s234_s27  ;;  %s156_s26 = int_to_ptr.vmem [resolvable:$true] %s155_s26 }
  0x36   : > { %s142_s30 = scalar_lea.sflag [#allocation4], %s491_s21  ;;  %s315_s2 = scalar_lea.vmem %s156_s26, 128 }
  0x37   : > { %v134_v2 = vmul.f32 1.442695, %v133_v1  ;;  %p316_p11 = scmp.ne.s32.totalorder %s156_s26, %s315_s2  ;;  %p546_p12 = scmp.ne.s32.totalorder %s540_s18, 0 }
  0x38   : > { %s382_s3 = smov [#allocation5]  }
  0x39   : > { %283 = vpow2.f32 %v134_v2  ;;  %p317_p13 = pnand %p316_p11, %p546_p12  ;;  %s319_s4 = sshll.u32 %s382_s3, 4  ;;  %s320_s4 = int_to_ptr.vmem [resolvable:$false] %s319_s4 }
  0x3a   : > { %s321_s5 = scalar_lea.vmem %s320_s4, 256  ;;  %p322_p3 = scmp.lt.s32.totalorder %s156_s26, %s320_s4 }
  0x3b   : > { %p318_p1 = pneg %p317_p13  ;;  %p323_p5 = scmp.lt.s32.totalorder %s321_s5, %s315_s2 }
  0x3d   : > { %p324_p8 = por %p323_p5, %p322_p3 }
  0x3f   : > { %p325_p10 = pnand %p324_p8, %p318_p1 }
  0x46   : > { %v284_v3 = vpop.eup %283 }
  0x47   : > { %v136_v4 = vmul.f32 -0.5, %v284_v3 }
  0x49   : > { %v137_v5 = vmul.f32 1.442695, %v136_v4 }
  0x4b   : > { %285 = vpow2.f32 %v137_v5 }
  0x58   : > { %v286_v6 = vpop.eup %285 }
  0x59   : > { %v139_v7 = vmul.f32 0.5, %v286_v6 }
  0x5b   : > { %140 = vst [vmem:[%s131_s25] sm:$0xff] %v139_v7 }
  0x5c   : > { %328 = shalt.err (!%p325_p10)
}
  0x5d   : > { %s329_s10 = scalar_lea.hbm %s153_s29, 128  ;;  %s333_s14 = scalar_lea.hbm %s535_s1, 256 }
  0x5e   : > { %p330_p2 = scmp.ne.s32.totalorder %s153_s29, %s329_s10  ;;  %p334_p7 = scmp.lt.s32.totalorder %s153_s29, %s535_s1 }
  0x5f   : > { %p335_p0 = scmp.lt.s32.totalorder %s333_s14, %s329_s10 }
  0x60   : > { %p331_p4 = pnand %p330_p2, %p546_p12 }
  0x61   : > { %p336_p6 = por %p335_p0, %p334_p7 }
  0x62   : > { %p332_p9 = pneg %p331_p4 }
  0x64   : > { %p337_p11 = pnand %p336_p6, %p332_p9 }
  0x66   : > { %340 = shalt.err (!%p337_p11)
}
  0x67   : > { %239 = dma.vmem_to_hbm [thread:$0]  (%p546_p12), %s156_s26, 128, %s153_s29, %s142_s30  }
  0x68 PF: > { %s167_s21 = sand.u32 1, %s367_s6   ;;  %p547_p13 = scmp.ne.s32.totalorder %s541_s19, 0 }
  0x69   : > { %p548_p1 = scmp.ge.s32.totalorder %s379_s9, 2  ;;  %s168_s22 = scalar_lea.sflag [#allocation4], %s167_s21 }
  0x6b   : > { %p246_p3 = pnand %p548_p1, %p547_p13 }
  0x6d   : > { %p247_p5 = pneg %p246_p3 }
  0x6f   : > { %362 = dma.done.wait (%p247_p5), %s168_s22, 128  }
  0x70   : > { %364 = vsyncadd (%p247_p5), %s168_s22, 4294967168  ;;  %p14_p8 = scmp.ge.s32.totalorder %s418_s12, 4   ;;  %s549_s6 = smov %s371_s7 }
  0x71   : > { %s550_s7 = smov %s375_s8  ;;  %s551_s8 = smov %s430_s15 }
  0x72   : > { %s552_s9 = smov %s418_s12  ;;  %16 = sbr.rel (!%p14_p8) target bundleno = 5 (0x5), region = 69 }
  0x77   :  { %173 = vsyncpa [#allocation3], 1 }
  0x78   :  { %175 = vsyncpa [#allocation3 + $0x1], 1 }
  0x79   :  { %176 = vsyncpa [#allocation4], 1 }
  0x7a   :  { %178 = vsyncpa [#allocation4 + $0x1], 1 }

</bundles_post_ra>
